<compile_context>
chip_gen: v7x
topology: tpu7x:2x2x1
jax: 0.10.0
libtpu: 0.0.40
codegen_flags: <defaults>
</compile_context>

<pallas_src>
import jax
import jax.numpy as jnp
from jax.experimental import pallas as pl
from jax.experimental.pallas import tpu as pltpu

_LANE = 128


def _round_up(v, m):
    return ((v + m - 1) // m) * m


def _cdiv(a, b):
    return -(-a // b)


def _sublane(dtype):
    # f32 -> 8 rows/vreg, bf16 -> 16, int8/fp8 -> 32 (packed along sublanes).
    return {4: 8, 2: 16, 1: 32}.get(jnp.dtype(dtype).itemsize, 8)


def _identity_block_kernel(x_ref, w1_ref, b1_ref, w2_ref, b2_ref, o_ref):
    # x_ref:  (TB, D)   w1_ref: (D, Hp)   b1_ref: (1, Hp)
    # w2_ref: (Hp, D)   b2_ref: (1, D)    o_ref:  (TB, D)
    x = x_ref[...]

    # Linear1 + ReLU: MXU matmul with f32 accumulation, VPU bias/ReLU in f32.
    h = jnp.dot(x, w1_ref[...], preferred_element_type=jnp.float32)
    h = jnp.maximum(h + b1_ref[...].astype(jnp.float32), 0.0)

    # Linear2 + residual add.
    y = jnp.dot(h.astype(w2_ref.dtype), w2_ref[...],
                preferred_element_type=jnp.float32)
    y = y + b2_ref[...].astype(jnp.float32)
    o_ref[...] = (x.astype(jnp.float32) + y).astype(o_ref.dtype)
    # NOTE: for very large hidden dims, add an "arbitrary" H grid axis with an
    # f32 accumulator scratch (init/finalize via pl.when) so the (TB, Hp)
    # intermediate and the weights never have to be fully VMEM-resident.


def prepare_params(w1_t, b1, w2_t, b2):
    """Pad the hidden dim to lane width ONCE at parameter-load time.

    w1_t: [D, H] (= Linear1.weight.T), b1: [H],
    w2_t: [H, D] (= Linear2.weight.T), b2: [D].
    Zero-padding extra hidden columns/rows is a mathematical no-op.  The batch
    and feature (D) axes of x are never padded -- x/out stream at their native
    width, so no extra HBM pad/slice passes are paid per call.
    """
    D, H = w1_t.shape
    Hp = _round_up(max(H, _LANE), _LANE)
    if Hp != H:
        w1_t = jnp.pad(w1_t, ((0, 0), (0, Hp - H)))
        b1 = jnp.pad(b1, (0, Hp - H))
        w2_t = jnp.pad(w2_t, ((0, Hp - H), (0, 0)))
    return (w1_t, b1.reshape(1, Hp), w2_t, b2.reshape(1, D))


def identity_nonlinear_block(x, params, *, target_tile_bytes=4 << 20):
    """x: [B, D]; params: output of prepare_params()."""
    w1_p, b1_p, w2_p, b2_p = params
    B, D = x.shape
    Dw, Hp = w1_p.shape
    assert Dw == D, "param / input feature-dim mismatch"

    x_isz = jnp.dtype(x.dtype).itemsize
    w_isz = jnp.dtype(w1_p.dtype).itemsize
    sub = _sublane(x.dtype)

    # Physical VMEM (v5e/v6e: 128 MiB, v7x: 64 MiB); conservative fallback.
    try:
        vmem_cap = int(pltpu.get_tpu_info().vmem_capacity_bytes)
    except Exception:
        vmem_cap = 64 << 20

    # Resident weights/biases (constant index_map -> no re-DMA across steps).
    w_bytes = (D * Hp + Hp + Hp * D + D) * w_isz
    # The pipeline double-buffers even constant blocks by default; drop to a
    # single buffer when that would eat a meaningful slice of VMEM (v7x).
    single_buffer_weights = (2 * w_bytes > vmem_cap // 4) and hasattr(pl, "Buffered")
    weight_bufs = 1 if single_buffer_weights else 2

    # Batch tile: large enough (~2-4 MiB of streamed x) to amortize the per-
    # grid-step overhead, small enough to fit next to the resident weights and
    # the (TB, Hp) f32 intermediate.
    if B <= sub:
        tb = B  # full-extent batch block (legal even when < 8 rows)
    else:
        tb = max(sub, (target_tile_bytes // max(D * x_isz, 1)) // sub * sub)
        if B >= 512:
            tb = max(tb, 512)
        # per-row VMEM: x/out double-buffers + f32 h (+ cast copy) + f32 temps.
        per_row = 4 * D * x_isz + Hp * (4 + w_isz) + 8 * D
        budget = int(vmem_cap * 0.8) - weight_bufs * w_bytes - (2 << 20)
        if budget > 0:
            tb = min(tb, max(sub, (budget // per_row) // sub * sub))
        tb = min(tb, (B // sub) * sub)  # never larger than the array
        tb = max(tb, sub)

    n_blocks = _cdiv(B, tb)
    # Keep the "parallel" batch grid even so both v7x TensorCores get equal work.
    if n_blocks > 1 and n_blocks % 2 == 1:
        tb = max(sub, _round_up(_cdiv(B, n_blocks + 1), sub))
        n_blocks = _cdiv(B, tb)

    # Scoped-VMEM limit: cover this kernel's footprint, never above physical.
    vmem_needed = (weight_bufs * w_bytes          # resident weights/biases
                   + 4 * tb * D * x_isz           # x + out, double-buffered
                   + tb * Hp * (4 + w_isz)        # h (f32) + cast copy
                   + 2 * tb * D * 4               # f32 residual temporaries
                   + (2 << 20))                   # slack
    vmem_limit = int(min(vmem_cap * 0.9, max(32 << 20, vmem_needed)))

    def _resident(shape):
        if single_buffer_weights:
            return pl.BlockSpec(shape, lambda i: (0, 0),
                                pipeline_mode=pl.Buffered(1))
        return pl.BlockSpec(shape, lambda i: (0, 0))

    return pl.pallas_call(
        _identity_block_kernel,
        out_shape=jax.ShapeDtypeStruct((B, D), x.dtype),
        grid_spec=pltpu.PrefetchScalarGridSpec(
            num_scalar_prefetch=0,
            grid=(n_blocks,),
            in_specs=[
                pl.BlockSpec((tb, D), lambda i: (i, 0)),   # x (streamed; ragged tail masked)
                _resident((D, Hp)),                        # w1 (VMEM-resident)
                _resident((1, Hp)),                        # b1
                _resident((Hp, D)),                        # w2
                _resident((1, D)),                         # b2
            ],
            out_specs=pl.BlockSpec((tb, D), lambda i: (i, 0)),
        ),
        compiler_params=pltpu.CompilerParams(
            dimension_semantics=("parallel",),  # megacore split of batch on v7x
            vmem_limit_bytes=vmem_limit,
        ),
    )(x, w1_p, b1_p, w2_p, b2_p)


if __name__ == "__main__":
    input_dim = 32
    hidden_dim = 64
    batch = 8

    key = jax.random.PRNGKey(0)
    keys = jax.random.split(key, 6)
    x = jax.random.normal(keys[0], (batch, input_dim), dtype=jnp.float32)

    # --- Case 1: module's init_identity() -> all-zero params -> out == x ---
    w1_t = jnp.zeros((input_dim, hidden_dim), jnp.float32)   # Linear1.weight.T
    b1 = jnp.zeros((hidden_dim,), jnp.float32)                # Linear1.bias
    w2_t = jnp.zeros((hidden_dim, input_dim), jnp.float32)    # Linear2.weight.T
    b2 = jnp.zeros((input_dim,), jnp.float32)                 # Linear2.bias

    params0 = prepare_params(w1_t, b1, w2_t, b2)
    out = jax.block_until_ready(identity_nonlinear_block(x, params0))
    ref = x + jnp.maximum(x @ w1_t + b1, 0.0) @ w2_t + b2
    assert out.shape == x.shape
    assert jnp.allclose(out, ref, atol=1e-5), "mismatch vs reference (zero init)"
    assert jnp.allclose(out, x, atol=1e-5), "identity init should give out == x"

    # --- Case 2: random params (validates the general forward math) ---
    w1_r = 0.1 * jax.random.normal(keys[1], (input_dim, hidden_dim), jnp.float32)
    b1_r = 0.1 * jax.random.normal(keys[2], (hidden_dim,), jnp.float32)
    w2_r = 0.1 * jax.random.normal(keys[3], (hidden_dim, input_dim), jnp.float32)
    b2_r = 0.1 * jax.random.normal(keys[4], (input_dim,), jnp.float32)
    params_r = prepare_params(w1_r, b1_r, w2_r, b2_r)

    out_r = jax.block_until_ready(identity_nonlinear_block(x, params_r))
    ref_r = x + jnp.maximum(x @ w1_r + b1_r, 0.0) @ w2_r + b2_r
    assert jnp.allclose(out_r, ref_r, atol=1e-4, rtol=1e-4), \
        "mismatch vs reference (random params)"

    # --- Case 3: ragged batch (B not a multiple of the tile) -> masked tail ---
    x3 = jax.random.normal(keys[5], (batch + 2, input_dim), dtype=jnp.float32)
    out3 = jax.block_until_ready(identity_nonlinear_block(x3, params_r))
    ref3 = x3 + jnp.maximum(x3 @ w1_r + b1_r, 0.0) @ w2_r + b2_r
    assert out3.shape == x3.shape
    assert jnp.allclose(out3, ref3, atol=1e-4, rtol=1e-4), \
        "mismatch vs reference (ragged batch)"

    print("KERNEL_OK")
</pallas_src>

<mosaic_0001>
module attributes {stable_mosaic.version = 11 : i64} {
  func.func @_identity_block_kernel(%arg0: i32, %arg1: memref<8x32xf32, #tpu.memory_space<vmem>>, %arg2: memref<32x128xf32, #tpu.memory_space<vmem>>, %arg3: memref<1x128xf32, #tpu.memory_space<vmem>>, %arg4: memref<128x32xf32, #tpu.memory_space<vmem>>, %arg5: memref<1x32xf32, #tpu.memory_space<vmem>>, %arg6: memref<8x32xf32, #tpu.memory_space<vmem>>) attributes {dimension_semantics = [#tpu.dimension_semantics<parallel>], iteration_bounds = array<i64: 1>, scalar_prefetch = 0 : i64, scratch_operands = 0 : i64, tpu.core_type = #tpu.core_type<tc>, window_params = [{transform_indices = @transform_0, window_bounds = array<i64: 8, 32>}, {pipeline_mode = #tpu.pipeline_mode<synchronous>, transform_indices = @transform_1, window_bounds = array<i64: 32, 128>}, {pipeline_mode = #tpu.pipeline_mode<synchronous>, transform_indices = @transform_2, window_bounds = array<i64: 1, 128>}, {pipeline_mode = #tpu.pipeline_mode<synchronous>, transform_indices = @transform_3, window_bounds = array<i64: 128, 32>}, {pipeline_mode = #tpu.pipeline_mode<synchronous>, transform_indices = @transform_4, window_bounds = array<i64: 1, 32>}, {transform_indices = @transform_5, window_bounds = array<i64: 8, 32>}]} {
    %c0 = arith.constant 0 : index
    %c0_0 = arith.constant 0 : index
    %0 = vector.load %arg1[%c0, %c0_0] : memref<8x32xf32, #tpu.memory_space<vmem>>, vector<8x32xf32>
    %c0_1 = arith.constant 0 : index
    %c0_2 = arith.constant 0 : index
    %1 = vector.load %arg2[%c0_1, %c0_2] : memref<32x128xf32, #tpu.memory_space<vmem>>, vector<32x128xf32>
    %cst = arith.constant dense<0.000000e+00> : vector<8x128xf32>
    %2 = tpu.matmul %0, %1, %cst {dimension_numbers = #tpu.dot_dimension_numbers<[1], [0], [0], [1], [0, 0, 1, 1], [], []>} : vector<8x32xf32>, vector<32x128xf32>, vector<8x128xf32> -> vector<8x128xf32>
    %c0_3 = arith.constant 0 : index
    %c0_4 = arith.constant 0 : index
    %3 = vector.load %arg3[%c0_3, %c0_4] : memref<1x128xf32, #tpu.memory_space<vmem>>, vector<1x128xf32>
    %4 = vector.broadcast %3 : vector<1x128xf32> to vector<8x128xf32>
    %5 = arith.addf %2, %4 : vector<8x128xf32>
    %cst_5 = arith.constant 0.000000e+00 : f32
    %6 = vector.broadcast %cst_5 : f32 to vector<8x128xf32>
    %7 = arith.maximumf %5, %6 : vector<8x128xf32>
    %c0_6 = arith.constant 0 : index
    %c0_7 = arith.constant 0 : index
    %8 = vector.load %arg4[%c0_6, %c0_7] : memref<128x32xf32, #tpu.memory_space<vmem>>, vector<128x32xf32>
    %cst_8 = arith.constant dense<0.000000e+00> : vector<8x32xf32>
    %9 = tpu.matmul %7, %8, %cst_8 {dimension_numbers = #tpu.dot_dimension_numbers<[1], [0], [0], [1], [0, 0, 1, 1], [], []>} : vector<8x128xf32>, vector<128x32xf32>, vector<8x32xf32> -> vector<8x32xf32>
    %c0_9 = arith.constant 0 : index
    %c0_10 = arith.constant 0 : index
    %10 = vector.load %arg5[%c0_9, %c0_10] : memref<1x32xf32, #tpu.memory_space<vmem>>, vector<1x32xf32>
    %11 = vector.broadcast %10 : vector<1x32xf32> to vector<8x32xf32>
    %12 = arith.addf %9, %11 : vector<8x32xf32>
    %13 = arith.addf %0, %12 : vector<8x32xf32>
    %c0_11 = arith.constant 0 : index
    %c0_12 = arith.constant 0 : index
    %14 = vector.load %arg6[%c0_11, %c0_12] : memref<8x32xf32, #tpu.memory_space<vmem>>, vector<8x32xf32>
    tpu.vector_store %arg6[%c0_11, %c0_12], %13 {strides = array<i32>} : memref<8x32xf32, #tpu.memory_space<vmem>>, vector<8x32xf32>,
    return
  }
  func.func @transform_0(%arg0: i32) -> (i32, i32) {
    %c0_i32 = arith.constant 0 : i32
    %c0_i32_0 = arith.constant 0 : i32
    return %arg0, %c0_i32 : i32, i32
  }
  func.func @transform_1(%arg0: i32) -> (i32, i32) {
    %c0_i32 = arith.constant 0 : i32
    %c0_i32_0 = arith.constant 0 : i32
    %c0_i32_1 = arith.constant 0 : i32
    return %c0_i32, %c0_i32_0 : i32, i32
  }
  func.func @transform_2(%arg0: i32) -> (i32, i32) {
    %c0_i32 = arith.constant 0 : i32
    %c0_i32_0 = arith.constant 0 : i32
    %c0_i32_1 = arith.constant 0 : i32
    return %c0_i32, %c0_i32_0 : i32, i32
  }
  func.func @transform_3(%arg0: i32) -> (i32, i32) {
    %c0_i32 = arith.constant 0 : i32
    %c0_i32_0 = arith.constant 0 : i32
    %c0_i32_1 = arith.constant 0 : i32
    return %c0_i32, %c0_i32_0 : i32, i32
  }
  func.func @transform_4(%arg0: i32) -> (i32, i32) {
    %c0_i32 = arith.constant 0 : i32
    %c0_i32_0 = arith.constant 0 : i32
    %c0_i32_1 = arith.constant 0 : i32
    return %c0_i32, %c0_i32_0 : i32, i32
  }
  func.func @transform_5(%arg0: i32) -> (i32, i32) {
    %c0_i32 = arith.constant 0 : i32
    %c0_i32_0 = arith.constant 0 : i32
    return %arg0, %c0_i32 : i32, i32
  }
}

</mosaic_0001>

<bundles_post_ra>
// kernel: tpu_custom_call.1
= control target key start
LH: loop header
LB: loop body
LE: loop exit
PB: predicated region body
PF: predicated region fallthrough
CT: control target
= control target key end

     0   :  { %v346_v3 = vmov 0.0|0.0   ;;  %vm347_vm0 = vmmov 0   ;;  %v348_v6 = vmov 0.0   ;;  %s463_s0 = inlined_call_operand.vmem [shape: f32[8,32], index: 0, kind: input, shape index: {}]   ;;  %s464_s1 = inlined_call_operand.vmem [shape: f32[32,128], index: 1, kind: input, shape index: {}]   ;;  %s465_s2 = inlined_call_operand.vmem [shape: f32[1,128], index: 2, kind: input, shape index: {}]   ;;  %s466_s3 = inlined_call_operand.vmem [shape: f32[128,32], index: 3, kind: input, shape index: {}]   ;;  %s467_s4 = inlined_call_operand.vmem [shape: f32[1,32], index: 4, kind: input, shape index: {}]   ;;  %s468_s5 = inlined_call_operand.hbm [shape: f32[8,32], index: 5, kind: output, shape index: {}]  }
   0x1   :  { %v22_v0 = vld [vmem:[%s464_s1] sm:$0xff]  ;;  %v23_v1 = vld [vmem:[%s464_s1 + $0x8] sm:$0xff]  ;;  %v24_v2 = vld [vmem:[%s464_s1 + $0x10] sm:$0xff]  ;;  %288 = vmatprep.subr.bf16.mxu0 %v346_v3  ;;  %250 = vmatprep.mubr.msk.f32.mxu0 %vm347_vm0, %v348_v6 }
   0x2   :  { %v289_v4 = vpack.c.bf16 %v23_v1, %v22_v0  ;;  %v25_v5 = vld [vmem:[%s464_s1 + $0x18] sm:$0xff]  ;;  %v108_v7 = vld [vmem:[%s466_s3] sm:$0xff]  ;;  %294 = vmatprep.subr.bf16.mxu1 %v346_v3  ;;  %v109_v8 = vld [vmem:[%s466_s3 + $0x8] sm:$0xff]  ;;  %285 = vmatprep.mubr.msk.f32.mxu1 %vm347_vm0, %v348_v6 }
   0x3   :  { %v110_v9 = vld [vmem:[%s466_s3 + $0x10] sm:$0xff]  ;;  %v111_v10 = vld [vmem:[%s466_s3 + $0x18] sm:$0xff]  ;;  %v292_v11 = vpack.c.bf16 %v25_v5, %v24_v2  ;;  %v295_v12 = vpack.c.bf16 %v109_v8, %v108_v7  ;;  %v112_v14 = vld [vmem:[%s466_s3 + $0x20] sm:$0xff] }
   0x4   :  { %290 = vmatpush3.bf16.msra.mxu0 %v289_v4  ;;  %v298_v13 = vpack.c.bf16 %v111_v10, %v110_v9  ;;  %v113_v15 = vld [vmem:[%s466_s3 + $0x28] sm:$0xff] }
   0x5   :  { %291 = vmatprep.subr.bf16.mxu0 %v346_v3  ;;  %296 = vmatpush3.bf16.msra.mxu1 %v295_v12 }
   0x6   :  { %297 = vmatprep.subr.bf16.mxu1 %v346_v3 }
   0x7   :  { %10 = vsyncpa [#allocation3], 0  ;;  %v21_v16 = vld [vmem:[%s463_s0] sm:$0xff]  ;;  %vm33_vm1 = vcmask 261120   ;;  %v301_v17 = vpack.c.bf16 %v113_v15, %v112_v14  ;;  %v114_v18 = vld [vmem:[%s466_s3 + $0x30] sm:$0xff]  ;;  %s349_s11 = smov [#allocation2]  }
   0x8   :  { %293 = vmatpush3.bf16.msra.mxu0 %v292_v11  ;;  %v115_v19 = vld [vmem:[%s466_s3 + $0x38] sm:$0xff]  ;;  %v116_v21 = vld [vmem:[%s466_s3 + $0x40] sm:$0xff]  ;;  %v117_v22 = vld [vmem:[%s466_s3 + $0x48] sm:$0xff]  ;;  %s209_s12 = sshll.u32 %s349_s11, 4  ;;  %s210_s12 = int_to_ptr.vmem [resolvable:$true] %s209_s12 }
   0x9   :  { %299 = vmatpush3.bf16.msra.mxu1 %v298_v13  ;;  %v304_v20 = vpack.c.bf16 %v115_v19, %v114_v18  ;;  %v307_v23 = vpack.c.bf16 %v117_v22, %v116_v21  ;;  %v118_v24 = vld [vmem:[%s466_s3 + $0x50] sm:$0xff]  ;;  %v119_v25 = vld [vmem:[%s466_s3 + $0x58] sm:$0xff]  ;;  %v120_v27 = vld [vmem:[%s466_s3 + $0x60] sm:$0xff]  ;;  %p327_p1 = scmp.lt.s32.totalorder %s210_s12, %s210_s12 }
   0xa   :  { %300 = vmatprep.subr.bf16.mxu1 %v346_v3  ;;  %v310_v26 = vpack.c.bf16 %v119_v25, %v118_v24  ;;  %v121_v28 = vld [vmem:[%s466_s3 + $0x68] sm:$0xff]  ;;  %v122_v30 = vld [vmem:[%s466_s3 + $0x70] sm:$0xff]  ;;  %v123_v31 = vld [vmem:[%s466_s3 + $0x78] sm:$0xff]  ;;  %s322_s3 = scalar_lea.vmem %s210_s12, 128 }
   0xb   :  { %251 = vmatmul.mubr.msk.f32.vlgmr.msra.gmra.mrb[0].mxu0 %vm33_vm1, %v21_v16  ;;  %v313_v29 = vpack.c.bf16 %v121_v28, %v120_v27  ;;  %v316_v32 = vpack.c.bf16 %v123_v31, %v122_v30  ;;  %v217_v33 = vld [vmem:[%s465_s2] ss:$0 sm:$0xff]  ;;  %p323_p0 = scmp.ne.s32.totalorder %s210_s12, %s322_s3  ;;  %p328_p2 = scmp.lt.s32.totalorder %s322_s3, %s322_s3 }
   0xc   :  { %v219_v38 = vld [vmem:[%s467_s4] ss:$0 sm:$0xff] }
   0xd   :  { %302 = vmatpush3.bf16.msra.mxu1 %v301_v17  ;;  %p329_p3 = por %p328_p2, %p327_p1 }
   0xe   :  { %303 = vmatprep.subr.bf16.mxu1 %v346_v3 }
   0xf   :  { %p330_p4 = pnand %p329_p3, %p323_p0 }
  0x11   :  { %305 = vmatpush3.bf16.msra.mxu1 %v304_v20 }
  0x12   :  { %306 = vmatprep.subr.bf16.mxu1 %v346_v3 }
  0x15   :  { %308 = vmatpush3.bf16.msra.mxu1 %v307_v23 }
  0x16   :  { %309 = vmatprep.subr.bf16.mxu1 %v346_v3 }
  0x19   :  { %311 = vmatpush3.bf16.msra.mxu1 %v310_v26 }
  0x1a   :  { %312 = vmatprep.subr.bf16.mxu1 %v346_v3 }
  0x1d   :  { %314 = vmatpush3.bf16.msra.mxu1 %v313_v29 }
  0x1e   :  { %315 = vmatprep.subr.bf16.mxu1 %v346_v3 }
  0x21   :  { %317 = vmatpush3.bf16.msra.mxu1 %v316_v32 }
  0xde   :  { %v103_v34 = vpop.f32.mrb[0].mxu0 }
  0xdf   :  { %v104_v35 = vadd.f32 %v217_v33, %v103_v34  ;;  %v252_v36 = vpop.f32.mrb[1].mxu0 }
  0xe1   :  { %v107_v37 = vmax.f32 %v104_v35, 0.0 }
  0xe3   :  { %286 = vmatmul.mubr.f32.vlgmr.msra.gmra.mrb[0].mxu1 %v107_v37 }
 0x1b6   :  { %v197_v39 = vpop.f32.mrb[0].mxu1 }
 0x1b7   :  { %v198_v40 = vadd.f32 %v219_v38, %v197_v39  ;;  %v287_v41 = vpop.f32.mrb[1].mxu1 }
 0x1b9   :  { %v201_v42 = vadd.f32 %v198_v40, %v21_v16 }
 0x1bb   :  { %202 = vst.msk [vmem:[#allocation2] sm:$0xff] %vm33_vm1, %v201_v42 }
 0x1bc   :  { %333 = shalt.err (!%p330_p4)
}
 0x1bd   :  { %s334_s4 = scalar_lea.hbm %s468_s5, 128 }
 0x1be   :  { %p335_p5 = scmp.ne.s32.totalorder %s468_s5, %s334_s4  ;;  %p338_p6 = scmp.lt.u32.totalorder %s334_s4, %s468_s5 }
 0x1c0   :  { %p340_p7 = pnand %p338_p6, %p335_p5 }
 0x1c2   :  { %343 = shalt.err (!%p340_p7)
}
 0x1c3   :  { %212 = dma.vmem_to_hbm [thread:$0]  %s210_s12, 128, %s468_s5, [#allocation3]  }
 0x1c4   :  { %344 = dma.done.wait [#allocation3], 128  }
 0x1c5   :  { %345 = vsyncadd [#allocation3], 4294967168 }
 0x1c6   :  { %216 = vsyncpa [#allocation3], 1 }

</bundles_post_ra>
